<compile_context>
chip_gen: v7x
topology: tpu7x:2x2x1
jax: 0.10.0
libtpu: 0.0.40
codegen_flags: <defaults>
</compile_context>

<pallas_src>
import jax
import jax.numpy as jnp
from jax.experimental import pallas as pl
from jax.experimental.pallas import tpu as pltpu


HIDDEN = 256
_ROW_GRANULE = 16      # bf16 packs 2 rows per sublane -> 16-row granule
_SMALL_BATCH = 256     # below this, a single grid step is cheapest


def _round_up(x, m):
    return ((x + m - 1) // m) * m


def _pick_tile_b(batch, desired):
    """Adaptive batch tile.

    - Small batches: one grid step, rounded up to the 16-row granule.
    - Large batches: >=2 grid steps (so v7x's two TensorCores both get work
      via the "parallel" grid axis), more steps if a single tile would exceed
      `desired` rows; tile = round_up(ceil(B/steps), 16) caps padding waste.
    """
    b = max(int(batch), 1)
    if b <= _SMALL_BATCH:
        return _round_up(b, _ROW_GRANULE)
    n_steps = max(2, -(-b // int(desired)))
    return _round_up(-(-b // n_steps), _ROW_GRANULE)


# --------------------------------------------------------------------------
# Kernel
# --------------------------------------------------------------------------
def _critic_kernel(
    sa_ref,                            # (TILE_B, in_dim) = concat(state, action)
    w14_ref, b14_ref,                  # fused first layer of both heads: (in_dim, 512), (1, 512)
    w2_ref, b2_ref, w22_ref, b22_ref,  # Q1 hidden layers
    w5_ref, b5_ref, w52_ref, b52_ref,  # Q2 hidden layers
    w36_ref, b36_ref,                  # (2, 256) packed output rows [w3^T ; w6^T], (1, 2) biases
    q_ref,                             # (TILE_B, 2) output [q1 | q2]
):
    f32 = jnp.float32
    cdt = w14_ref.dtype  # matmul-operand dtype (bf16 by default; f32 also works)

    # Fused first layer of both heads (single MXU contraction over in_dim):
    #   [h0 | g0] = relu(sa @ [w1 | w4] + [b1 | b4])
    sa = sa_ref[...].astype(cdt)
    hg = jnp.dot(sa, w14_ref[...], preferred_element_type=f32)
    hg = jnp.maximum(hg + b14_ref[...].astype(f32), 0.0)
    h = hg[:, :HIDDEN]          # lane-boundary (256) split -> no relayout
    g = hg[:, HIDDEN:]

    # ----- Q1 head -----
    h = jnp.maximum(
        jnp.dot(h.astype(cdt), w2_ref[...], preferred_element_type=f32)
        + b2_ref[...].astype(f32), 0.0)
    h = jnp.maximum(
        jnp.dot(h.astype(cdt), w22_ref[...], preferred_element_type=f32)
        + b22_ref[...].astype(f32), 0.0)
    # N=1 "matmul" as VPU multiply + lane reduction (keeps the MXU free and
    # avoids 1-lane masked matmul output handling).
    q1 = jnp.sum(h * w36_ref[0:1, :].astype(f32), axis=-1, keepdims=True)

    # ----- Q2 head -----
    g = jnp.maximum(
        jnp.dot(g.astype(cdt), w5_ref[...], preferred_element_type=f32)
        + b5_ref[...].astype(f32), 0.0)
    g = jnp.maximum(
        jnp.dot(g.astype(cdt), w52_ref[...], preferred_element_type=f32)
        + b52_ref[...].astype(f32), 0.0)
    q2 = jnp.sum(g * w36_ref[1:2, :].astype(f32), axis=-1, keepdims=True)

    q = jnp.concatenate([q1, q2], axis=-1) + b36_ref[...].astype(f32)
    q_ref[...] = q.astype(q_ref.dtype)


# --------------------------------------------------------------------------
# Parameter packing (done once per call here; pre-pack in real training code)
# --------------------------------------------------------------------------
def _pack_params(params, weight_dtype):
    f32 = jnp.float32
    wdt = weight_dtype
    # Fused first-layer weights/biases of both heads.
    w14 = jnp.concatenate([params["w1"], params["w4"]], axis=1).astype(wdt)  # (in, 512)
    b14 = jnp.concatenate([params["b1"], params["b4"]], axis=1).astype(f32)  # (1, 512)
    # Packed output rows: row 0 = w3^T, row 1 = w6^T.
    w36 = jnp.concatenate([params["w3"].T, params["w6"].T], axis=0).astype(wdt)  # (2, 256)
    b36 = jnp.concatenate([params["b3"], params["b6"]], axis=1).astype(f32)      # (1, 2)
    return dict(
        w14=w14, b14=b14,
        w2=params["w2"].astype(wdt), b2=params["b2"].astype(f32),
        w22=params["w2_2"].astype(wdt), b22=params["b2_2"].astype(f32),
        w5=params["w5"].astype(wdt), b5=params["b5"].astype(f32),
        w52=params["w5_2"].astype(wdt), b52=params["b5_2"].astype(f32),
        w36=w36, b36=b36,
    )


# --------------------------------------------------------------------------
# Wrapper
# --------------------------------------------------------------------------
def critic_forward(state, action, params, *, tile_b=1024, weight_dtype=jnp.bfloat16):
    """Pallas implementation of Critic.forward(state, action) -> (q1, q2).

    `weight_dtype=jnp.float32` gives strict parity with the PyTorch module;
    bf16 (default) halves weight bytes and runs the MXU at full rate.
    """
    B, state_dim = state.shape
    action_dim = action.shape[1]
    in_dim = state_dim + action_dim

    # Single HBM concat (cheap vs. ~560 kFLOP per input row) -> one merged
    # first-layer contraction in the kernel.
    sa = jnp.concatenate([state, action], axis=-1)

    tile_b = _pick_tile_b(B, tile_b)
    pb = _round_up(B, tile_b)
    if pb != B:
        sa = jnp.pad(sa, ((0, pb - B), (0, 0)))

    p = _pack_params(params, weight_dtype)
    ordered = [
        sa,
        p["w14"], p["b14"],
        p["w2"], p["b2"], p["w22"], p["b22"],
        p["w5"], p["b5"], p["w52"], p["b52"],
        p["w36"], p["b36"],
    ]

    grid = (pb // tile_b,)

    # Weights/biases: same block every grid step -> fetched once, VMEM-resident.
    in_specs = [pl.BlockSpec((tile_b, in_dim), lambda i: (i, 0))] + [
        pl.BlockSpec(a.shape, lambda i: (0, 0)) for a in ordered[1:]
    ]
    out_specs = pl.BlockSpec((tile_b, 2), lambda i: (i, 0))

    wbytes = jnp.dtype(weight_dtype).itemsize
    weight_bytes = (in_dim * 2 * HIDDEN + 4 * HIDDEN * HIDDEN + 2 * HIDDEN) * wbytes \
                   + (2 * HIDDEN + 4 * HIDDEN + 2) * 4
    cost = pl.CostEstimate(
        flops=2 * pb * (in_dim * 2 * HIDDEN + 4 * HIDDEN * HIDDEN + 2 * HIDDEN),
        transcendentals=0,
        bytes_accessed=weight_bytes + pb * (in_dim + 2) * 4,
    )

    q = pl.pallas_call(
        _critic_kernel,
        out_shape=jax.ShapeDtypeStruct((pb, 2), jnp.float32),
        grid=grid,
        in_specs=in_specs,
        out_specs=out_specs,
        compiler_params=pltpu.CompilerParams(
            dimension_semantics=("parallel",),   # v7x: shard batch tiles over 2 TCs
        ),
        cost_estimate=cost,
    )(*ordered)

    q = q[:B]
    return q[:, 0:1], q[:, 1:2]


# --------------------------------------------------------------------------
# Parameter init + references
# --------------------------------------------------------------------------
def init_critic_params(state_dim, action_dim, key):
    """Deterministic synthetic parameters matching nn.Linear shapes.

    PyTorch nn.Linear(in, out) has weight (out, in); we store the transpose
    (in, out) so x @ W + b == x @ W_torch.T + b.
    """
    in_dim = state_dim + action_dim
    keys = jax.random.split(key, 8)

    def linear(k, fan_in, fan_out):
        kw, kb = jax.random.split(k)
        bound = 1.0 / jnp.sqrt(jnp.float32(fan_in))
        w = jax.random.uniform(kw, (fan_in, fan_out), jnp.float32, -bound, bound)
        b = jax.random.uniform(kb, (1, fan_out), jnp.float32, -bound, bound)
        return w, b

    p = {}
    p["w1"], p["b1"] = linear(keys[0], in_dim, HIDDEN)
    p["w2"], p["b2"] = linear(keys[1], HIDDEN, HIDDEN)
    p["w2_2"], p["b2_2"] = linear(keys[2], HIDDEN, HIDDEN)
    p["w3"], p["b3"] = linear(keys[3], HIDDEN, 1)
    p["w4"], p["b4"] = linear(keys[4], in_dim, HIDDEN)
    p["w5"], p["b5"] = linear(keys[5], HIDDEN, HIDDEN)
    p["w5_2"], p["b5_2"] = linear(keys[6], HIDDEN, HIDDEN)
    p["w6"], p["b6"] = linear(keys[7], HIDDEN, 1)
    return p


def critic_forward_ref(state, action, params):
    """Pure-f32 JAX reference of the PyTorch forward pass."""
    sa = jnp.concatenate([state, action], axis=-1)
    h = jax.nn.relu(sa @ params["w1"] + params["b1"])
    h = jax.nn.relu(h @ params["w2"] + params["b2"])
    h = jax.nn.relu(h @ params["w2_2"] + params["b2_2"])
    q1 = h @ params["w3"] + params["b3"]
    g = jax.nn.relu(sa @ params["w4"] + params["b4"])
    g = jax.nn.relu(g @ params["w5"] + params["b5"])
    g = jax.nn.relu(g @ params["w5_2"] + params["b5_2"])
    q2 = g @ params["w6"] + params["b6"]
    return q1, q2


def critic_forward_emulated(state, action, params, weight_dtype):
    """Emulates the kernel math exactly (bf16 matmul inputs, f32 accumulate)."""
    f32 = jnp.float32
    sa = jnp.concatenate([state, action], axis=-1)

    def dot(x, w):
        return jnp.dot(x.astype(weight_dtype), w.astype(weight_dtype),
                       preferred_element_type=f32)

    def head(w_a, b_a, w_b, b_b, w_c, b_c, w_d, b_d):
        h = jnp.maximum(dot(sa, w_a) + b_a, 0.0)
        h = jnp.maximum(dot(h, w_b) + b_b, 0.0)
        h = jnp.maximum(dot(h, w_c) + b_c, 0.0)
        w_row = w_d.T.astype(weight_dtype).astype(f32)
        return jnp.sum(h * w_row, axis=-1, keepdims=True) + b_d

    q1 = head(params["w1"], params["b1"], params["w2"], params["b2"],
              params["w2_2"], params["b2_2"], params["w3"], params["b3"])
    q2 = head(params["w4"], params["b4"], params["w5"], params["b5"],
              params["w5_2"], params["b5_2"], params["w6"], params["b6"])
    return q1, q2


# --------------------------------------------------------------------------
# Demo / self-test
# --------------------------------------------------------------------------
if __name__ == "__main__":
    state_dim, action_dim, batch = 24, 8, 2

    key = jax.random.PRNGKey(0)
    k_state, k_action, k_params = jax.random.split(key, 3)

    state = jax.random.normal(k_state, (batch, state_dim), jnp.float32)
    action = jax.random.normal(k_action, (batch, action_dim), jnp.float32)
    params = init_critic_params(state_dim, action_dim, k_params)

    # --- small batch (16-row tile, single grid step) ---
    q1, q2 = critic_forward(state, action, params)
    jax.block_until_ready((q1, q2))
    assert q1.shape == (batch, 1) and q2.shape == (batch, 1)

    # Tight check against an exact emulation of the kernel's bf16/f32 math.
    e1, e2 = critic_forward_emulated(state, action, params, jnp.bfloat16)
    assert jnp.allclose(q1, e1, atol=2e-3, rtol=2e-3)
    assert jnp.allclose(q2, e2, atol=2e-3, rtol=2e-3)

    # Loose check against the pure-f32 PyTorch-semantics reference
    # (difference is only bf16 weight/activation rounding).
    r1, r2 = critic_forward_ref(state, action, params)
    assert jnp.allclose(q1, r1, atol=5e-2, rtol=5e-2)
    assert jnp.allclose(q2, r2, atol=5e-2, rtol=5e-2)

    # --- larger ragged batch exercising the adaptive batch grid:
    #     B=300 -> 2 grid steps of 160 rows (only 20 padded rows). ---
    Bb = 300
    kb_s, kb_a = jax.random.split(jax.random.PRNGKey(1))
    big_state = jax.random.normal(kb_s, (Bb, state_dim), jnp.float32)
    big_action = jax.random.normal(kb_a, (Bb, action_dim), jnp.float32)
    bq1, bq2 = critic_forward(big_state, big_action, params)
    jax.block_until_ready((bq1, bq2))
    be1, be2 = critic_forward_emulated(big_state, big_action, params, jnp.bfloat16)
    assert bq1.shape == (Bb, 1) and bq2.shape == (Bb, 1)
    assert jnp.allclose(bq1, be1, atol=2e-3, rtol=2e-3)
    assert jnp.allclose(bq2, be2, atol=2e-3, rtol=2e-3)

    print("KERNEL_OK")
</pallas_src>

<mosaic_0001>
module attributes {stable_mosaic.version = 11 : i64} {
  func.func @_critic_kernel(%arg0: i32, %arg1: memref<16x32xf32, #tpu.memory_space<vmem>>, %arg2: memref<32x512xbf16, #tpu.memory_space<vmem>>, %arg3: memref<1x512xf32, #tpu.memory_space<vmem>>, %arg4: memref<256x256xbf16, #tpu.memory_space<vmem>>, %arg5: memref<1x256xf32, #tpu.memory_space<vmem>>, %arg6: memref<256x256xbf16, #tpu.memory_space<vmem>>, %arg7: memref<1x256xf32, #tpu.memory_space<vmem>>, %arg8: memref<256x256xbf16, #tpu.memory_space<vmem>>, %arg9: memref<1x256xf32, #tpu.memory_space<vmem>>, %arg10: memref<256x256xbf16, #tpu.memory_space<vmem>>, %arg11: memref<1x256xf32, #tpu.memory_space<vmem>>, %arg12: memref<2x256xbf16, #tpu.memory_space<vmem>>, %arg13: memref<1x2xf32, #tpu.memory_space<vmem>>, %arg14: memref<16x2xf32, #tpu.memory_space<vmem>>) attributes {dimension_semantics = [#tpu.dimension_semantics<parallel>], iteration_bounds = array<i64: 1>, scalar_prefetch = 0 : i64, scratch_operands = 0 : i64, tpu.core_type = #tpu.core_type<tc>, window_params = [{transform_indices = @transform_0, window_bounds = array<i64: 16, 32>}, {pipeline_mode = #tpu.pipeline_mode<synchronous>, transform_indices = @transform_1, window_bounds = array<i64: 32, 512>}, {pipeline_mode = #tpu.pipeline_mode<synchronous>, transform_indices = @transform_2, window_bounds = array<i64: 1, 512>}, {pipeline_mode = #tpu.pipeline_mode<synchronous>, transform_indices = @transform_3, window_bounds = array<i64: 256, 256>}, {pipeline_mode = #tpu.pipeline_mode<synchronous>, transform_indices = @transform_4, window_bounds = array<i64: 1, 256>}, {pipeline_mode = #tpu.pipeline_mode<synchronous>, transform_indices = @transform_5, window_bounds = array<i64: 256, 256>}, {pipeline_mode = #tpu.pipeline_mode<synchronous>, transform_indices = @transform_6, window_bounds = array<i64: 1, 256>}, {pipeline_mode = #tpu.pipeline_mode<synchronous>, transform_indices = @transform_7, window_bounds = array<i64: 256, 256>}, {pipeline_mode = #tpu.pipeline_mode<synchronous>, transform_indices = @transform_8, window_bounds = array<i64: 1, 256>}, {pipeline_mode = #tpu.pipeline_mode<synchronous>, transform_indices = @transform_9, window_bounds = array<i64: 256, 256>}, {pipeline_mode = #tpu.pipeline_mode<synchronous>, transform_indices = @transform_10, window_bounds = array<i64: 1, 256>}, {pipeline_mode = #tpu.pipeline_mode<synchronous>, transform_indices = @transform_11, window_bounds = array<i64: 2, 256>}, {pipeline_mode = #tpu.pipeline_mode<synchronous>, transform_indices = @transform_12, window_bounds = array<i64: 1, 2>}, {transform_indices = @transform_13, window_bounds = array<i64: 16, 2>}]} {
    %c0 = arith.constant 0 : index
    %c0_0 = arith.constant 0 : index
    %0 = vector.load %arg1[%c0, %c0_0] : memref<16x32xf32, #tpu.memory_space<vmem>>, vector<16x32xf32>
    %1 = arith.truncf %0 : vector<16x32xf32> to vector<16x32xbf16>
    %c0_1 = arith.constant 0 : index
    %c0_2 = arith.constant 0 : index
    %2 = vector.load %arg2[%c0_1, %c0_2] : memref<32x512xbf16, #tpu.memory_space<vmem>>, vector<32x512xbf16>
    %cst = arith.constant dense<0.000000e+00> : vector<16x512xf32>
    %3 = tpu.matmul %1, %2, %cst {dimension_numbers = #tpu.dot_dimension_numbers<[1], [0], [0], [1], [0, 0, 1, 1], [], []>} : vector<16x32xbf16>, vector<32x512xbf16>, vector<16x512xf32> -> vector<16x512xf32>
    %c0_3 = arith.constant 0 : index
    %c0_4 = arith.constant 0 : index
    %4 = vector.load %arg3[%c0_3, %c0_4] : memref<1x512xf32, #tpu.memory_space<vmem>>, vector<1x512xf32>
    %5 = vector.broadcast %4 : vector<1x512xf32> to vector<16x512xf32>
    %6 = arith.addf %3, %5 : vector<16x512xf32>
    %cst_5 = arith.constant 0.000000e+00 : f32
    %7 = vector.broadcast %cst_5 : f32 to vector<16x512xf32>
    %8 = arith.maximumf %6, %7 : vector<16x512xf32>
    %9 = vector.extract_strided_slice %8 {offsets = [0, 0], sizes = [16, 256], strides = [1, 1]} : vector<16x512xf32> to vector<16x256xf32>
    %10 = vector.extract_strided_slice %8 {offsets = [0, 256], sizes = [16, 256], strides = [1, 1]} : vector<16x512xf32> to vector<16x256xf32>
    %11 = arith.truncf %9 : vector<16x256xf32> to vector<16x256xbf16>
    %c0_6 = arith.constant 0 : index
    %c0_7 = arith.constant 0 : index
    %12 = vector.load %arg4[%c0_6, %c0_7] : memref<256x256xbf16, #tpu.memory_space<vmem>>, vector<256x256xbf16>
    %cst_8 = arith.constant dense<0.000000e+00> : vector<16x256xf32>
    %13 = tpu.matmul %11, %12, %cst_8 {dimension_numbers = #tpu.dot_dimension_numbers<[1], [0], [0], [1], [0, 0, 1, 1], [], []>} : vector<16x256xbf16>, vector<256x256xbf16>, vector<16x256xf32> -> vector<16x256xf32>
    %c0_9 = arith.constant 0 : index
    %c0_10 = arith.constant 0 : index
    %14 = vector.load %arg5[%c0_9, %c0_10] : memref<1x256xf32, #tpu.memory_space<vmem>>, vector<1x256xf32>
    %15 = vector.broadcast %14 : vector<1x256xf32> to vector<16x256xf32>
    %16 = arith.addf %13, %15 : vector<16x256xf32>
    %cst_11 = arith.constant 0.000000e+00 : f32
    %17 = vector.broadcast %cst_11 : f32 to vector<16x256xf32>
    %18 = arith.maximumf %16, %17 : vector<16x256xf32>
    %19 = arith.truncf %18 : vector<16x256xf32> to vector<16x256xbf16>
    %c0_12 = arith.constant 0 : index
    %c0_13 = arith.constant 0 : index
    %20 = vector.load %arg6[%c0_12, %c0_13] : memref<256x256xbf16, #tpu.memory_space<vmem>>, vector<256x256xbf16>
    %cst_14 = arith.constant dense<0.000000e+00> : vector<16x256xf32>
    %21 = tpu.matmul %19, %20, %cst_14 {dimension_numbers = #tpu.dot_dimension_numbers<[1], [0], [0], [1], [0, 0, 1, 1], [], []>} : vector<16x256xbf16>, vector<256x256xbf16>, vector<16x256xf32> -> vector<16x256xf32>
    %c0_15 = arith.constant 0 : index
    %c0_16 = arith.constant 0 : index
    %22 = vector.load %arg7[%c0_15, %c0_16] : memref<1x256xf32, #tpu.memory_space<vmem>>, vector<1x256xf32>
    %23 = vector.broadcast %22 : vector<1x256xf32> to vector<16x256xf32>
    %24 = arith.addf %21, %23 : vector<16x256xf32>
    %cst_17 = arith.constant 0.000000e+00 : f32
    %25 = vector.broadcast %cst_17 : f32 to vector<16x256xf32>
    %26 = arith.maximumf %24, %25 : vector<16x256xf32>
    %c0_18 = arith.constant 0 : index
    %c0_19 = arith.constant 0 : index
    %27 = vector.load %arg12[%c0_18, %c0_19] : memref<2x256xbf16, #tpu.memory_space<vmem>>, vector<1x256xbf16>
    %28 = arith.extf %27 : vector<1x256xbf16> to vector<1x256xf32>
    %29 = vector.broadcast %28 : vector<1x256xf32> to vector<16x256xf32>
    %30 = arith.mulf %26, %29 : vector<16x256xf32>
    %cst_20 = arith.constant dense<0.000000e+00> : vector<16xf32>
    %31 = vector.multi_reduction <add>, %30, %cst_20 [1] : vector<16x256xf32> to vector<16xf32>
    %32 = vector.shape_cast %31 : vector<16xf32> to vector<16x1xf32>
    %33 = arith.truncf %10 : vector<16x256xf32> to vector<16x256xbf16>
    %c0_21 = arith.constant 0 : index
    %c0_22 = arith.constant 0 : index
    %34 = vector.load %arg8[%c0_21, %c0_22] : memref<256x256xbf16, #tpu.memory_space<vmem>>, vector<256x256xbf16>
    %cst_23 = arith.constant dense<0.000000e+00> : vector<16x256xf32>
    %35 = tpu.matmul %33, %34, %cst_23 {dimension_numbers = #tpu.dot_dimension_numbers<[1], [0], [0], [1], [0, 0, 1, 1], [], []>} : vector<16x256xbf16>, vector<256x256xbf16>, vector<16x256xf32> -> vector<16x256xf32>
    %c0_24 = arith.constant 0 : index
    %c0_25 = arith.constant 0 : index
    %36 = vector.load %arg9[%c0_24, %c0_25] : memref<1x256xf32, #tpu.memory_space<vmem>>, vector<1x256xf32>
    %37 = vector.broadcast %36 : vector<1x256xf32> to vector<16x256xf32>
    %38 = arith.addf %35, %37 : vector<16x256xf32>
    %cst_26 = arith.constant 0.000000e+00 : f32
    %39 = vector.broadcast %cst_26 : f32 to vector<16x256xf32>
    %40 = arith.maximumf %38, %39 : vector<16x256xf32>
    %41 = arith.truncf %40 : vector<16x256xf32> to vector<16x256xbf16>
    %c0_27 = arith.constant 0 : index
    %c0_28 = arith.constant 0 : index
    %42 = vector.load %arg10[%c0_27, %c0_28] : memref<256x256xbf16, #tpu.memory_space<vmem>>, vector<256x256xbf16>
    %cst_29 = arith.constant dense<0.000000e+00> : vector<16x256xf32>
    %43 = tpu.matmul %41, %42, %cst_29 {dimension_numbers = #tpu.dot_dimension_numbers<[1], [0], [0], [1], [0, 0, 1, 1], [], []>} : vector<16x256xbf16>, vector<256x256xbf16>, vector<16x256xf32> -> vector<16x256xf32>
    %c0_30 = arith.constant 0 : index
    %c0_31 = arith.constant 0 : index
    %44 = vector.load %arg11[%c0_30, %c0_31] : memref<1x256xf32, #tpu.memory_space<vmem>>, vector<1x256xf32>
    %45 = vector.broadcast %44 : vector<1x256xf32> to vector<16x256xf32>
    %46 = arith.addf %43, %45 : vector<16x256xf32>
    %cst_32 = arith.constant 0.000000e+00 : f32
    %47 = vector.broadcast %cst_32 : f32 to vector<16x256xf32>
    %48 = arith.maximumf %46, %47 : vector<16x256xf32>
    %c1 = arith.constant 1 : index
    %c0_33 = arith.constant 0 : index
    %49 = vector.load %arg12[%c1, %c0_33] : memref<2x256xbf16, #tpu.memory_space<vmem>>, vector<1x256xbf16>
    %50 = arith.extf %49 : vector<1x256xbf16> to vector<1x256xf32>
    %51 = vector.broadcast %50 : vector<1x256xf32> to vector<16x256xf32>
    %52 = arith.mulf %48, %51 : vector<16x256xf32>
    %cst_34 = arith.constant dense<0.000000e+00> : vector<16xf32>
    %53 = vector.multi_reduction <add>, %52, %cst_34 [1] : vector<16x256xf32> to vector<16xf32>
    %54 = vector.shape_cast %53 : vector<16xf32> to vector<16x1xf32>
    %55 = tpu.concatenate %32, %54 in 1 : vector<16x1xf32>, vector<16x1xf32> -> vector<16x2xf32>
    %c0_35 = arith.constant 0 : index
    %c0_36 = arith.constant 0 : index
    %56 = vector.load %arg13[%c0_35, %c0_36] : memref<1x2xf32, #tpu.memory_space<vmem>>, vector<1x2xf32>
    %57 = vector.broadcast %56 : vector<1x2xf32> to vector<16x2xf32>
    %58 = arith.addf %55, %57 : vector<16x2xf32>
    %c0_37 = arith.constant 0 : index
    %c0_38 = arith.constant 0 : index
    %59 = vector.load %arg14[%c0_37, %c0_38] : memref<16x2xf32, #tpu.memory_space<vmem>>, vector<16x2xf32>
    tpu.vector_store %arg14[%c0_37, %c0_38], %58 {strides = array<i32>} : memref<16x2xf32, #tpu.memory_space<vmem>>, vector<16x2xf32>,
    return
  }
  func.func @transform_0(%arg0: i32) -> (i32, i32) {
    %c0_i32 = arith.constant 0 : i32
    %c0_i32_0 = arith.constant 0 : i32
    return %arg0, %c0_i32 : i32, i32
  }
  func.func @transform_1(%arg0: i32) -> (i32, i32) {
    %c0_i32 = arith.constant 0 : i32
    %c0_i32_0 = arith.constant 0 : i32
    %c0_i32_1 = arith.constant 0 : i32
    return %c0_i32, %c0_i32_0 : i32, i32
  }
  func.func @transform_2(%arg0: i32) -> (i32, i32) {
    %c0_i32 = arith.constant 0 : i32
    %c0_i32_0 = arith.constant 0 : i32
    %c0_i32_1 = arith.constant 0 : i32
    return %c0_i32, %c0_i32_0 : i32, i32
  }
  func.func @transform_3(%arg0: i32) -> (i32, i32) {
    %c0_i32 = arith.constant 0 : i32
    %c0_i32_0 = arith.constant 0 : i32
    %c0_i32_1 = arith.constant 0 : i32
    return %c0_i32, %c0_i32_0 : i32, i32
  }
  func.func @transform_4(%arg0: i32) -> (i32, i32) {
    %c0_i32 = arith.constant 0 : i32
    %c0_i32_0 = arith.constant 0 : i32
    %c0_i32_1 = arith.constant 0 : i32
    return %c0_i32, %c0_i32_0 : i32, i32
  }
  func.func @transform_5(%arg0: i32) -> (i32, i32) {
    %c0_i32 = arith.constant 0 : i32
    %c0_i32_0 = arith.constant 0 : i32
    %c0_i32_1 = arith.constant 0 : i32
    return %c0_i32, %c0_i32_0 : i32, i32
  }
  func.func @transform_6(%arg0: i32) -> (i32, i32) {
    %c0_i32 = arith.constant 0 : i32
    %c0_i32_0 = arith.constant 0 : i32
    %c0_i32_1 = arith.constant 0 : i32
    return %c0_i32, %c0_i32_0 : i32, i32
  }
  func.func @transform_7(%arg0: i32) -> (i32, i32) {
    %c0_i32 = arith.constant 0 : i32
    %c0_i32_0 = arith.constant 0 : i32
    %c0_i32_1 = arith.constant 0 : i32
    return %c0_i32, %c0_i32_0 : i32, i32
  }
  func.func @transform_8(%arg0: i32) -> (i32, i32) {
    %c0_i32 = arith.constant 0 : i32
    %c0_i32_0 = arith.constant 0 : i32
    %c0_i32_1 = arith.constant 0 : i32
    return %c0_i32, %c0_i32_0 : i32, i32
  }
  func.func @transform_9(%arg0: i32) -> (i32, i32) {
    %c0_i32 = arith.constant 0 : i32
    %c0_i32_0 = arith.constant 0 : i32
    %c0_i32_1 = arith.constant 0 : i32
    return %c0_i32, %c0_i32_0 : i32, i32
  }
  func.func @transform_10(%arg0: i32) -> (i32, i32) {
    %c0_i32 = arith.constant 0 : i32
    %c0_i32_0 = arith.constant 0 : i32
    %c0_i32_1 = arith.constant 0 : i32
    return %c0_i32, %c0_i32_0 : i32, i32
  }
  func.func @transform_11(%arg0: i32) -> (i32, i32) {
    %c0_i32 = arith.constant 0 : i32
    %c0_i32_0 = arith.constant 0 : i32
    %c0_i32_1 = arith.constant 0 : i32
    return %c0_i32, %c0_i32_0 : i32, i32
  }
  func.func @transform_12(%arg0: i32) -> (i32, i32) {
    %c0_i32 = arith.constant 0 : i32
    %c0_i32_0 = arith.constant 0 : i32
    %c0_i32_1 = arith.constant 0 : i32
    return %c0_i32, %c0_i32_0 : i32, i32
  }
  func.func @transform_13(%arg0: i32) -> (i32, i32) {
    %c0_i32 = arith.constant 0 : i32
    %c0_i32_0 = arith.constant 0 : i32
    return %arg0, %c0_i32 : i32, i32
  }
}

</mosaic_0001>

<bundles_post_ra>
// kernel: tpu_custom_call.1
= control target key start
LH: loop header
LB: loop body
LE: loop exit
PB: predicated region body
PF: predicated region fallthrough
CT: control target
= control target key end

     0   :  { %18 = vsyncpa [#allocation3], 0  ;;  %s2124_s0 = inlined_call_operand.hbm [shape: f32[16,32], index: 0, kind: input, shape index: {}]   ;;  %s2125_s1 = inlined_call_operand.hbm [shape: bf16[32,512], index: 1, kind: input, shape index: {}]   ;;  %s2126_s2 = inlined_call_operand.vmem [shape: f32[1,512], index: 2, kind: input, shape index: {}]   ;;  %s2127_s3 = inlined_call_operand.hbm [shape: bf16[256,256], index: 3, kind: input, shape index: {}]   ;;  %s2128_s4 = inlined_call_operand.vmem [shape: f32[1,256], index: 4, kind: input, shape index: {}]   ;;  %s2129_s5 = inlined_call_operand.hbm [shape: bf16[256,256], index: 5, kind: input, shape index: {}]   ;;  %s2130_s6 = inlined_call_operand.vmem [shape: f32[1,256], index: 6, kind: input, shape index: {}]   ;;  %s2131_s7 = inlined_call_operand.hbm [shape: bf16[256,256], index: 7, kind: input, shape index: {}]   ;;  %s2132_s8 = inlined_call_operand.vmem [shape: f32[1,256], index: 8, kind: input, shape index: {}]   ;;  %s2133_s9 = inlined_call_operand.hbm [shape: bf16[256,256], index: 9, kind: input, shape index: {}]   ;;  %s2134_s10 = inlined_call_operand.vmem [shape: f32[1,256], index: 10, kind: input, shape index: {}]   ;;  %s2135_s11 = inlined_call_operand.vmem [shape: bf16[2,256], index: 11, kind: input, shape index: {}]   ;;  %s2136_s12 = inlined_call_operand.vmem [shape: f32[1,2], index: 12, kind: input, shape index: {}]   ;;  %s2137_s13 = inlined_call_operand.vmem [shape: f32[16,2], index: 13, kind: output, shape index: {}]  }
   0x1   :  { %19 = vsyncpa [#allocation5], 0 }
   0x2   :  { %20 = vsyncpa [#allocation8], 0 }
   0x3   :  { %21 = vsyncpa [#allocation11], 0  ;;  %s1886_s25 = smov [#allocation4]   ;;  %s1746_s29 = scalar_lea.hbm %s2125_s1, 1024 }
   0x4   :  { %s39_s26 = sshll.u32 %s1886_s25, 4  ;;  %p1747_p0 = scmp.ne.s32.totalorder %s2125_s1, %s1746_s29  ;;  %s40_s26 = int_to_ptr.vmem [resolvable:$true] %s39_s26 }
   0x5   :  { %p1750_p1 = scmp.lt.u32.totalorder %s1746_s29, %s2125_s1 }
   0x7   :  { %p1752_p2 = pnand %p1750_p1, %p1747_p0 }
   0x9   :  { %1755 = shalt.err (!%p1752_p2)
}
   0xa   :  { %s1756_s17 = scalar_lea.vmem %s40_s26, 1024  ;;  %p1761_p4 = scmp.lt.s32.totalorder %s40_s26, %s40_s26 }
   0xb   :  { %p1757_p3 = scmp.ne.s32.totalorder %s40_s26, %s1756_s17  ;;  %p1762_p5 = scmp.lt.s32.totalorder %s1756_s17, %s1756_s17 }
   0xd   :  { %p1763_p6 = por %p1762_p5, %p1761_p4 }
   0xf   :  { %p1764_p7 = pnand %p1763_p6, %p1757_p3 }
  0x11   :  { %1767 = shalt.err (!%p1764_p7)
}
  0x12   :  { %s1887_s18 = smov 256   ;;  %s1888_s19 = smov 16  }
  0x13   :  { %45 = dma.hbm_to_vmem [thread:$0]  %s2125_s1, 1024, %s40_s26, [#allocation5], %s1887_s18, %s1887_s18, %s1888_s19  }
  0x14   :  { %s1889_s22 = smov [#allocation7]   ;;  %s1890_s24 = smov [#allocation2]  }
  0x15   :  { %s67_s23 = sshll.u32 %s1889_s22, 4  ;;  %s27_s25 = sshll.u32 %s1890_s24, 4  ;;  %s68_s23 = int_to_ptr.vmem [resolvable:$true] %s67_s23  ;;  %s28_s25 = int_to_ptr.vmem [resolvable:$true] %s27_s25 }
  0x16   :  { %s1768_s29 = scalar_lea.hbm %s2129_s5, 4096 }
  0x17   :  { %p1769_p8 = scmp.ne.s32.totalorder %s2129_s5, %s1768_s29  ;;  %p1772_p9 = scmp.lt.u32.totalorder %s1768_s29, %s2129_s5 }
  0x19   :  { %p1774_p10 = pnand %p1772_p9, %p1769_p8 }
  0x1b   :  { %1777 = shalt.err (!%p1774_p10)
}
  0x1c   :  { %s1778_s1 = scalar_lea.vmem %s68_s23, 4096  ;;  %p1783_p12 = scmp.lt.s32.totalorder %s68_s23, %s68_s23 }
  0x1d   :  { %p1779_p11 = scmp.ne.s32.totalorder %s68_s23, %s1778_s1  ;;  %p1784_p13 = scmp.lt.s32.totalorder %s1778_s1, %s1778_s1 }
  0x1f   :  { %p1785_p0 = por %p1784_p13, %p1783_p12 }
  0x21   :  { %p1786_p1 = pnand %p1785_p0, %p1779_p11 }
  0x23   :  { %1789 = shalt.err (!%p1786_p1)
}
  0x24   :  { %s1891_s26 = smov 128   ;;  %s1892_s17 = smov 8  }
  0x25   :  { %73 = dma.hbm_to_vmem [thread:$0]  %s2129_s5, 4096, %s68_s23, [#allocation8], %s1891_s26, %s1891_s26, %s1892_s17  }
  0x26   :  { %s1790_s22 = scalar_lea.hbm %s2124_s0, 256 }
  0x27   :  { %p1791_p2 = scmp.ne.s32.totalorder %s2124_s0, %s1790_s22  ;;  %p1794_p3 = scmp.lt.u32.totalorder %s1790_s22, %s2124_s0 }
  0x29   :  { %p1796_p4 = pnand %p1794_p3, %p1791_p2 }
  0x2b   :  { %1799 = shalt.err (!%p1796_p4)
}
  0x2c   :  { %s1800_s30 = scalar_lea.vmem %s28_s25, 256  ;;  %p1805_p6 = scmp.lt.s32.totalorder %s28_s25, %s28_s25 }
  0x2d   :  { %p1801_p5 = scmp.ne.s32.totalorder %s28_s25, %s1800_s30  ;;  %p1806_p7 = scmp.lt.s32.totalorder %s1800_s30, %s1800_s30 }
  0x2f   :  { %p1807_p8 = por %p1806_p7, %p1805_p6 }
  0x31   :  { %p1808_p9 = pnand %p1807_p8, %p1801_p5 }
  0x33   :  { %1811 = shalt.err (!%p1808_p9)
}
  0x34   :  { %33 = dma.hbm_to_vmem [thread:$0]  %s2124_s0, 256, %s28_s25, [#allocation3], %s1891_s26, %s1891_s26, %s1892_s17  }
  0x35   :  { %s1893_s14 = smov [#allocation6]   ;;  %s1894_s16 = smov [#allocation9]  }
  0x36   :  { %s53_s15 = sshll.u32 %s1893_s14, 4  ;;  %s81_s1 = sshll.u32 %s1894_s16, 4  ;;  %s54_s15 = int_to_ptr.vmem [resolvable:$true] %s53_s15  ;;  %s82_s1 = int_to_ptr.vmem [resolvable:$true] %s81_s1 }
  0x37   :  { %s1812_s20 = scalar_lea.hbm %s2127_s3, 4096 }
  0x38   :  { %p1813_p10 = scmp.ne.s32.totalorder %s2127_s3, %s1812_s20  ;;  %p1816_p11 = scmp.lt.u32.totalorder %s1812_s20, %s2127_s3 }
  0x3a   :  { %p1818_p12 = pnand %p1816_p11, %p1813_p10 }
  0x3c   :  { %1821 = shalt.err (!%p1818_p12)
}
  0x3d   :  { %s1822_s0 = scalar_lea.vmem %s54_s15, 4096  ;;  %p1827_p0 = scmp.lt.s32.totalorder %s54_s15, %s54_s15 }
  0x3e   :  { %p1823_p13 = scmp.ne.s32.totalorder %s54_s15, %s1822_s0  ;;  %p1828_p1 = scmp.lt.s32.totalorder %s1822_s0, %s1822_s0 }
  0x40   :  { %p1829_p2 = por %p1828_p1, %p1827_p0 }
  0x42   :  { %p1830_p3 = pnand %p1829_p2, %p1823_p13 }
  0x44   :  { %1833 = shalt.err (!%p1830_p3)
}
  0x45   :  { %59 = dma.hbm_to_vmem [thread:$0]  %s2127_s3, 4096, %s54_s15, [#allocation5], %s1891_s26, %s1891_s26, %s1892_s17  }
  0x46   :  { %s1834_s5 = scalar_lea.hbm %s2131_s7, 4096 }
  0x47   :  { %p1835_p4 = scmp.ne.s32.totalorder %s2131_s7, %s1834_s5  ;;  %p1838_p5 = scmp.lt.u32.totalorder %s1834_s5, %s2131_s7 }
  0x49   :  { %p1840_p6 = pnand %p1838_p5, %p1835_p4 }
  0x4b   :  { %1843 = shalt.err (!%p1840_p6)
}
  0x4c   :  { %s1844_s19 = scalar_lea.vmem %s82_s1, 4096  ;;  %p1849_p8 = scmp.lt.s32.totalorder %s82_s1, %s82_s1 }
  0x4d   :  { %p1845_p7 = scmp.ne.s32.totalorder %s82_s1, %s1844_s19  ;;  %p1850_p9 = scmp.lt.s32.totalorder %s1844_s19, %s1844_s19 }
  0x4f   :  { %p1851_p10 = por %p1850_p9, %p1849_p8 }
  0x51   :  { %p1852_p11 = pnand %p1851_p10, %p1845_p7 }
  0x53   :  { %1855 = shalt.err (!%p1852_p11)
}
  0x54   :  { %87 = dma.hbm_to_vmem [thread:$0]  %s2131_s7, 4096, %s82_s1, [#allocation8], %s1891_s26, %s1891_s26, %s1892_s17  }
  0x55   :  { %s1895_s20 = smov [#allocation10]   ;;  %s1856_s27 = scalar_lea.hbm %s2133_s9, 4096 }
  0x56   :  { %s95_s21 = sshll.u32 %s1895_s20, 4  ;;  %p1857_p12 = scmp.ne.s32.totalorder %s2133_s9, %s1856_s27  ;;  %s96_s21 = int_to_ptr.vmem [resolvable:$true] %s95_s21 }
  0x57   :  { %p1860_p13 = scmp.lt.u32.totalorder %s1856_s27, %s2133_s9 }
  0x59   :  { %p1862_p0 = pnand %p1860_p13, %p1857_p12 }
  0x5b   :  { %1865 = shalt.err (!%p1862_p0)
}
  0x5c   :  { %s1866_s30 = scalar_lea.vmem %s96_s21, 4096  ;;  %p1871_p2 = scmp.lt.s32.totalorder %s96_s21, %s96_s21 }
  0x5d   :  { %p1867_p1 = scmp.ne.s32.totalorder %s96_s21, %s1866_s30  ;;  %p1872_p3 = scmp.lt.s32.totalorder %s1866_s30, %s1866_s30 }
  0x5f   :  { %p1873_p4 = por %p1872_p3, %p1871_p2 }
  0x61   :  { %p1874_p5 = pnand %p1873_p4, %p1867_p1 }
  0x63   :  { %1877 = shalt.err (!%p1874_p5)
}
  0x64   :  { %101 = dma.hbm_to_vmem [thread:$0]  %s2133_s9, 4096, %s96_s21, [#allocation11], %s1891_s26, %s1891_s26, %s1892_s17  }
  0x65   :  { %1878 = dma.done.wait [#allocation3], 256  }
  0x66   :  { %1879 = vsyncadd [#allocation3], 4294967040 }
  0x67   :  { %1880 = dma.done.wait [#allocation5], 5120  }
  0x68   :  { %1881 = vsyncadd [#allocation5], 4294962176 }
  0x69   :  { %1882 = dma.done.wait [#allocation8], 8192  }
  0x6a   :  { %1883 = vsyncadd [#allocation8], 4294959104 }
  0x6b   :  { %1884 = dma.done.wait [#allocation11], 4096  }
  0x6c   :  { %1885 = vsyncadd [#allocation11], 4294963200  ;;  %v1896_v0 = vmov 0   ;;  %v1542_v1 = vld [vmem:[#allocation4 + $0x4] ss:$16 sps:$4 sm:$0xff]   ;;  %v128_v6 = vld [vmem:[#allocation2 + $0x8] sm:$0xff]  ;;  %v140_v45 = vlaneseq }
  0x6d   :  { %236 = vmatprep.mubr.bf16.mxu0 %v1896_v0  ;;  %279 = vmatprep.mubr.bf16.mxu1 %v1896_v0  ;;  %v1544_v2 = vld [vmem:[#allocation4] ss:$16 sps:$4 sm:$0xff]   ;;  %v1545_v3 = vld [vmem:[#allocation4 + $0x24] ss:$16 sps:$4 sm:$0xff]   ;;  %v1548_v7 = vld [vmem:[#allocation4 + $0xc] ss:$16 sps:$4 sm:$0xff]  }
  0x6e   :  { %204 = vmatprep.subr.bf16.mxu0 %v1542_v1  ;;  %v1547_v4 = vld [vmem:[#allocation4 + $0x20] ss:$16 sps:$4 sm:$0xff]   ;;  %v1550_v8 = vld [vmem:[#allocation4 + $0x8] ss:$16 sps:$4 sm:$0xff]   ;;  %v1551_v9 = vld [vmem:[#allocation4 + $0x2c] ss:$16 sps:$4 sm:$0xff]   ;;  %247 = vmatprep.subr.bf16.mxu1 %v1548_v7 }
  0x6f   :  { %v127_v5 = vld [vmem:[#allocation2] sm:$0xff]  ;;  %205 = vmatpush1.bf16.msra.mxu0 %v1544_v2  ;;  %v1553_v10 = vld [vmem:[#allocation4 + $0x28] ss:$16 sps:$4 sm:$0xff]   ;;  %vm200_vm0 = vcmask 261120   ;;  %248 = vmatpush1.bf16.msra.mxu1 %v1550_v8  ;;  %v1556_v13 = vld [vmem:[#allocation6 + $0x4] ss:$8 sps:$4 sm:$0xff]  }
  0x70   :  { %206 = vmatprep.subr.bf16.mxu0 %v1545_v3  ;;  %v129_v11 = vpack.c.bf16 %v128_v6, %v127_v5  ;;  %v1554_v12 = vld [vmem:[#allocation6] ss:$8 sps:$4 sm:$0xff]   ;;  %249 = vmatprep.subr.bf16.mxu1 %v1551_v9  ;;  %v1559_v14 = vld [vmem:[#allocation6 + $0x14] ss:$8 sps:$4 sm:$0xff]   ;;  %v1557_v15 = vld [vmem:[#allocation6 + $0x10] ss:$8 sps:$4 sm:$0xff]  }
  0x71   :  { %v1562_v16 = vld [vmem:[#allocation6 + $0x24] ss:$8 sps:$4 sm:$0xff]   ;;  %v1560_v17 = vld [vmem:[#allocation6 + $0x20] ss:$8 sps:$4 sm:$0xff]   ;;  %v1565_v18 = vld [vmem:[#allocation6 + $0x34] ss:$8 sps:$4 sm:$0xff]  }
  0x72   :  { %v1563_v19 = vld [vmem:[#allocation6 + $0x30] ss:$8 sps:$4 sm:$0xff]   ;;  %v1568_v20 = vld [vmem:[#allocation6 + $0x44] ss:$8 sps:$4 sm:$0xff]   ;;  %v1566_v21 = vld [vmem:[#allocation6 + $0x40] ss:$8 sps:$4 sm:$0xff]  }
  0x73   :  { %207 = vmatpush1.bf16.msra.mxu0 %v1547_v4  ;;  %250 = vmatpush1.bf16.msra.mxu1 %v1553_v10  ;;  %v1571_v22 = vld [vmem:[#allocation6 + $0x54] ss:$8 sps:$4 sm:$0xff]   ;;  %v1569_v23 = vld [vmem:[#allocation6 + $0x50] ss:$8 sps:$4 sm:$0xff]   ;;  %v1574_v24 = vld [vmem:[#allocation6 + $0x64] ss:$8 sps:$4 sm:$0xff]  }
  0x74   :  { %504 = vmatprep.subr.bf16.mxu0 %v1556_v13  ;;  %v1572_v25 = vld [vmem:[#allocation6 + $0x60] ss:$8 sps:$4 sm:$0xff]   ;;  %v1577_v26 = vld [vmem:[#allocation6 + $0x74] ss:$8 sps:$4 sm:$0xff]   ;;  %v1575_v27 = vld [vmem:[#allocation6 + $0x70] ss:$8 sps:$4 sm:$0xff]  }
  0x75   :  { %v1580_v28 = vld [vmem:[#allocation6 + $0x84] ss:$8 sps:$4 sm:$0xff]   ;;  %v1578_v29 = vld [vmem:[#allocation6 + $0x80] ss:$8 sps:$4 sm:$0xff]   ;;  %v1583_v30 = vld [vmem:[#allocation6 + $0x94] ss:$8 sps:$4 sm:$0xff]  }
  0x76   :  { %1400 = vmatmul.mubr.msk.bf16.vlgmr.msra.gmra.mrb[0].mxu0 %vm200_vm0, %v129_v11  ;;  %1401 = vmatmul.mubr.msk.bf16.vlgmr.msra.gmra.mrb[0].mxu1 %vm200_vm0, %v129_v11  ;;  %v1581_v31 = vld [vmem:[#allocation6 + $0x90] ss:$8 sps:$4 sm:$0xff]   ;;  %v1586_v32 = vld [vmem:[#allocation6 + $0xa4] ss:$8 sps:$4 sm:$0xff]   ;;  %v1584_v33 = vld [vmem:[#allocation6 + $0xa0] ss:$8 sps:$4 sm:$0xff]  }
  0x77   :  { %505 = vmatpush1.bf16.msra.mxu0 %v1554_v12  ;;  %v1589_v34 = vld [vmem:[#allocation6 + $0xb4] ss:$8 sps:$4 sm:$0xff]   ;;  %v1587_v35 = vld [vmem:[#allocation6 + $0xb0] ss:$8 sps:$4 sm:$0xff]   ;;  %v1592_v36 = vld [vmem:[#allocation6 + $0xc4] ss:$8 sps:$4 sm:$0xff]  }
  0x78   :  { %506 = vmatprep.subr.bf16.mxu0 %v1559_v14  ;;  %v1590_v37 = vld [vmem:[#allocation6 + $0xc0] ss:$8 sps:$4 sm:$0xff]   ;;  %v1595_v38 = vld [vmem:[#allocation6 + $0xd4] ss:$8 sps:$4 sm:$0xff]   ;;  %v1593_v39 = vld [vmem:[#allocation6 + $0xd0] ss:$8 sps:$4 sm:$0xff]  }
  0x79   :  { %v1598_v40 = vld [vmem:[#allocation6 + $0xe4] ss:$8 sps:$4 sm:$0xff]   ;;  %v1596_v41 = vld [vmem:[#allocation6 + $0xe0] ss:$8 sps:$4 sm:$0xff]   ;;  %v1601_v42 = vld [vmem:[#allocation6 + $0xf4] ss:$8 sps:$4 sm:$0xff]  }
  0x7a   :  { %v1599_v43 = vld [vmem:[#allocation6 + $0xf0] ss:$8 sps:$4 sm:$0xff]   ;;  %v1604_v44 = vld [vmem:[#allocation9 + $0x4] ss:$8 sps:$4 sm:$0xff]   ;;  %v2054_v46 = vshrl.u32 %v140_v45, 7  ;;  %vm1369_vm1 = vcmask 7168  }
  0x7b   :  { %507 = vmatpush1.bf16.msra.mxu0 %v1557_v15  ;;  %v804_v47 = vld [vmem:[%s2135_s11] sm:$0x3]  ;;  %v1650_v51 = vld [vmem:[#allocation7] ss:$8 sps:$4 sm:$0xff]   ;;  %v1652_v52 = vld [vmem:[#allocation7 + $0x4] ss:$8 sps:$4 sm:$0xff]  }
  0x7c   :  { %508 = vmatprep.subr.bf16.mxu0 %v1562_v16  ;;  %v2059_v48 = vunpack.c.l.bf16 %v804_v47  ;;  %v154_v49 = vsub.s32 3, %v2054_v46  ;;  %v1655_v53 = vld [vmem:[#allocation7 + $0x14] ss:$8 sps:$4 sm:$0xff]   ;;  %757 = vmatprep.subr.bf16.mxu1 %v1652_v52  ;;  %v1653_v54 = vld [vmem:[#allocation7 + $0x10] ss:$8 sps:$4 sm:$0xff]   ;;  %v2068_v12 = vsub.s32 0, %v2054_v46 }
  0x7d   :  { %758 = vmatpush1.bf16.msra.mxu1 %v1650_v51  ;;  %v1658_v55 = vld [vmem:[#allocation7 + $0x24] ss:$8 sps:$4 sm:$0xff]   ;;  %v1656_v56 = vld [vmem:[#allocation7 + $0x20] ss:$8 sps:$4 sm:$0xff]   ;;  %v1661_v57 = vld [vmem:[#allocation7 + $0x34] ss:$8 sps:$4 sm:$0xff]  }
  0x7e   :  { %v2065_v50 = vrot.slane %v2059_v48, %v154_v49  ;;  %759 = vmatprep.subr.bf16.mxu1 %v1655_v53  ;;  %v1659_v58 = vld [vmem:[#allocation7 + $0x30] ss:$8 sps:$4 sm:$0xff]   ;;  %v1664_v59 = vld [vmem:[#allocation7 + $0x44] ss:$8 sps:$4 sm:$0xff]   ;;  %v1662_v60 = vld [vmem:[#allocation7 + $0x40] ss:$8 sps:$4 sm:$0xff]  }
  0x7f   :  { %509 = vmatpush1.bf16.msra.mxu0 %v1560_v17  ;;  %v1667_v61 = vld [vmem:[#allocation7 + $0x54] ss:$8 sps:$4 sm:$0xff]   ;;  %v1665_v62 = vld [vmem:[#allocation7 + $0x50] ss:$8 sps:$4 sm:$0xff]   ;;  %v1670_v63 = vld [vmem:[#allocation7 + $0x64] ss:$8 sps:$4 sm:$0xff]  }
  0x80   :  { %510 = vmatprep.subr.bf16.mxu0 %v1565_v18  ;;  %v1668_v0 = vld [vmem:[#allocation7 + $0x60] ss:$8 sps:$4 sm:$0xff]   ;;  %v1673_v1 = vld [vmem:[#allocation7 + $0x74] ss:$8 sps:$4 sm:$0xff]   ;;  %v1671_v2 = vld [vmem:[#allocation7 + $0x70] ss:$8 sps:$4 sm:$0xff]  }
  0x81   :  { %760 = vmatpush1.bf16.msra.mxu1 %v1653_v54  ;;  %v1676_v3 = vld [vmem:[#allocation7 + $0x84] ss:$8 sps:$4 sm:$0xff]   ;;  %v1674_v4 = vld [vmem:[#allocation7 + $0x80] ss:$8 sps:$4 sm:$0xff]   ;;  %v1679_v5 = vld [vmem:[#allocation7 + $0x94] ss:$8 sps:$4 sm:$0xff]  }
  0x82   :  { %761 = vmatprep.subr.bf16.mxu1 %v1658_v55  ;;  %v1677_v6 = vld [vmem:[#allocation7 + $0x90] ss:$8 sps:$4 sm:$0xff]   ;;  %v1682_v7 = vld [vmem:[#allocation7 + $0xa4] ss:$8 sps:$4 sm:$0xff]   ;;  %v1680_v8 = vld [vmem:[#allocation7 + $0xa0] ss:$8 sps:$4 sm:$0xff]  }
  0x83   :  { %511 = vmatpush1.bf16.msra.mxu0 %v1563_v19  ;;  %v1685_v9 = vld [vmem:[#allocation7 + $0xb4] ss:$8 sps:$4 sm:$0xff]   ;;  %v1683_v10 = vld [vmem:[#allocation7 + $0xb0] ss:$8 sps:$4 sm:$0xff]   ;;  %v1688_v11 = vld [vmem:[#allocation7 + $0xc4] ss:$8 sps:$4 sm:$0xff]  }
  0x84   :  { %512 = vmatprep.subr.bf16.mxu0 %v1568_v20  ;;  %v138_v13 = vld [vmem:[%s2126_s2] sm:$0xf]  ;;  %v2074_v14 = vsub.s32 1, %v2054_v46  ;;  %v1686_v15 = vld [vmem:[#allocation7 + $0xc0] ss:$8 sps:$4 sm:$0xff]   ;;  %v150_v18 = vsub.s32 2, %v2054_v46 }
  0x85   :  { %762 = vmatpush1.bf16.msra.mxu1 %v1656_v56  ;;  %v1691_v16 = vld [vmem:[#allocation7 + $0xd4] ss:$8 sps:$4 sm:$0xff]   ;;  %v143_v17 = vrot.slane %v138_v13, %v2068_v12  ;;  %v1689_v20 = vld [vmem:[#allocation7 + $0xd0] ss:$8 sps:$4 sm:$0xff]   ;;  %v1602_v45 = vld [vmem:[#allocation9] ss:$8 sps:$4 sm:$0xff]  }
  0x86   :  { %763 = vmatprep.subr.bf16.mxu1 %v1661_v57  ;;  %v147_v19 = vrot.slane %v138_v13, %v2074_v14  ;;  %v1607_v51 = vld [vmem:[#allocation9 + $0x14] ss:$8 sps:$4 sm:$0xff]   ;;  %v1605_v55 = vld [vmem:[#allocation9 + $0x10] ss:$8 sps:$4 sm:$0xff]   ;;  %v1610_v57 = vld [vmem:[#allocation9 + $0x24] ss:$8 sps:$4 sm:$0xff]  }
  0x87   :  { %513 = vmatpush1.bf16.msra.mxu0 %v1566_v21  ;;  %vm1381_vm2 = vcmask 15360  }
  0x88   :  { %514 = vmatprep.subr.bf16.mxu0 %v1571_v22 }
  0x89   :  { %764 = vmatpush1.bf16.msra.mxu1 %v1659_v58  ;;  %v1608_v58 = vld [vmem:[#allocation9 + $0x20] ss:$8 sps:$4 sm:$0xff]  }
  0x8a   :  { %765 = vmatprep.subr.bf16.mxu1 %v1664_v59  ;;  %v1613_v59 = vld [vmem:[#allocation9 + $0x34] ss:$8 sps:$4 sm:$0xff]  }
  0x8b   :  { %515 = vmatpush1.bf16.msra.mxu0 %v1569_v23 }
  0x8c   :  { %516 = vmatprep.subr.bf16.mxu0 %v1574_v24  ;;  %v151_v24 = vrot.slane %v138_v13, %v150_v18 }
  0x8d   :  { %766 = vmatpush1.bf16.msra.mxu1 %v1662_v60  ;;  %v1611_v60 = vld [vmem:[#allocation9 + $0x30] ss:$8 sps:$4 sm:$0xff]  }
  0x8e   :  { %767 = vmatprep.subr.bf16.mxu1 %v1667_v61  ;;  %v1616_v61 = vld [vmem:[#allocation9 + $0x44] ss:$8 sps:$4 sm:$0xff]  }
  0x8f   :  { %517 = vmatpush1.bf16.msra.mxu0 %v1572_v25 }
  0x90   :  { %518 = vmatprep.subr.bf16.mxu0 %v1577_v26 }
  0x91   :  { %768 = vmatpush1.bf16.msra.mxu1 %v1665_v62  ;;  %v1614_v62 = vld [vmem:[#allocation9 + $0x40] ss:$8 sps:$4 sm:$0xff]  }
  0x92   :  { %769 = vmatprep.subr.bf16.mxu1 %v1670_v63  ;;  %v1619_v63 = vld [vmem:[#allocation9 + $0x54] ss:$8 sps:$4 sm:$0xff]  }
  0x93   :  { %519 = vmatpush1.bf16.msra.mxu0 %v1575_v27  ;;  %v155_v27 = vrot.slane %v138_v13, %v154_v49  ;;  %v1635_v13 = vld [vmem:[#allocation9 + $0xb0] ss:$8 sps:$4 sm:$0xff]  }
  0x94   :  { %520 = vmatprep.subr.bf16.mxu0 %v1580_v28 }
  0x95   :  { %770 = vmatpush1.bf16.msra.mxu1 %v1668_v0  ;;  %v1617_v0 = vld [vmem:[#allocation9 + $0x50] ss:$8 sps:$4 sm:$0xff]  }
  0x96   :  { %771 = vmatprep.subr.bf16.mxu1 %v1673_v1  ;;  %v1622_v1 = vld [vmem:[#allocation9 + $0x64] ss:$8 sps:$4 sm:$0xff]  }
  0x97   :  { %521 = vmatpush1.bf16.msra.mxu0 %v1578_v29 }
  0x98   :  { %522 = vmatprep.subr.bf16.mxu0 %v1583_v30 }
  0x99   :  { %772 = vmatpush1.bf16.msra.mxu1 %v1671_v2  ;;  %v1620_v2 = vld [vmem:[#allocation9 + $0x60] ss:$8 sps:$4 sm:$0xff]  }
  0x9a   :  { %773 = vmatprep.subr.bf16.mxu1 %v1676_v3  ;;  %v1625_v3 = vld [vmem:[#allocation9 + $0x74] ss:$8 sps:$4 sm:$0xff]  }
  0x9b   :  { %523 = vmatpush1.bf16.msra.mxu0 %v1581_v31 }
  0x9c   :  { %524 = vmatprep.subr.bf16.mxu0 %v1586_v32 }
  0x9d   :  { %774 = vmatpush1.bf16.msra.mxu1 %v1674_v4  ;;  %v1623_v4 = vld [vmem:[#allocation9 + $0x70] ss:$8 sps:$4 sm:$0xff]  }
  0x9e   :  { %775 = vmatprep.subr.bf16.mxu1 %v1679_v5  ;;  %v1628_v5 = vld [vmem:[#allocation9 + $0x84] ss:$8 sps:$4 sm:$0xff]  }
  0x9f   :  { %525 = vmatpush1.bf16.msra.mxu0 %v1584_v33 }
  0xa0   :  { %526 = vmatprep.subr.bf16.mxu0 %v1589_v34 }
  0xa1   :  { %776 = vmatpush1.bf16.msra.mxu1 %v1677_v6  ;;  %v1626_v6 = vld [vmem:[#allocation9 + $0x80] ss:$8 sps:$4 sm:$0xff]  }
  0xa2   :  { %777 = vmatprep.subr.bf16.mxu1 %v1682_v7  ;;  %v1631_v7 = vld [vmem:[#allocation9 + $0x94] ss:$8 sps:$4 sm:$0xff]  }
  0xa3   :  { %527 = vmatpush1.bf16.msra.mxu0 %v1587_v35 }
  0xa4   :  { %528 = vmatprep.subr.bf16.mxu0 %v1592_v36 }
  0xa5   :  { %778 = vmatpush1.bf16.msra.mxu1 %v1680_v8  ;;  %v1629_v8 = vld [vmem:[#allocation9 + $0x90] ss:$8 sps:$4 sm:$0xff]  }
  0xa6   :  { %779 = vmatprep.subr.bf16.mxu1 %v1685_v9  ;;  %v1634_v9 = vld [vmem:[#allocation9 + $0xa4] ss:$8 sps:$4 sm:$0xff]  }
  0xa7   :  { %529 = vmatpush1.bf16.msra.mxu0 %v1590_v37 }
  0xa8   :  { %530 = vmatprep.subr.bf16.mxu0 %v1595_v38 }
  0xa9   :  { %780 = vmatpush1.bf16.msra.mxu1 %v1683_v10  ;;  %v1632_v10 = vld [vmem:[#allocation9 + $0xa0] ss:$8 sps:$4 sm:$0xff]  }
  0xaa   :  { %781 = vmatprep.subr.bf16.mxu1 %v1688_v11  ;;  %v1637_v11 = vld [vmem:[#allocation9 + $0xb4] ss:$8 sps:$4 sm:$0xff]  }
  0xab   :  { %531 = vmatpush1.bf16.msra.mxu0 %v1593_v39 }
  0xac   :  { %532 = vmatprep.subr.bf16.mxu0 %v1598_v40 }
  0xad   :  { %782 = vmatpush1.bf16.msra.mxu1 %v1686_v15  ;;  %v1640_v15 = vld [vmem:[#allocation9 + $0xc4] ss:$8 sps:$4 sm:$0xff]  }
  0xae   :  { %783 = vmatprep.subr.bf16.mxu1 %v1691_v16  ;;  %v1638_v16 = vld [vmem:[#allocation9 + $0xc0] ss:$8 sps:$4 sm:$0xff]  }
  0xaf   :  { %533 = vmatpush1.bf16.msra.mxu0 %v1596_v41 }
  0xb0   :  { %534 = vmatprep.subr.bf16.mxu0 %v1601_v42 }
  0xb1   :  { %784 = vmatpush1.bf16.msra.mxu1 %v1689_v20  ;;  %v1646_v20 = vld [vmem:[#allocation9 + $0xe4] ss:$8 sps:$4 sm:$0xff]  }
  0xb3   :  { %535 = vmatpush1.bf16.msra.mxu0 %v1599_v43 }
  0xb4   :  { %1041 = vmatprep.subr.bf16.mxu0 %v1604_v44 }
 0x149   :  { %v238_v21 = vpop.f32.mrb[0].mxu0  ;;  %v281_v31 = vpop.f32.mrb[0].mxu1 }
 0x14a   :  { %v239_v22 = vadd.f32 %v238_v21, %v143_v17  ;;  %v240_v23 = vpop.f32.mrb[1].mxu0  ;;  %v282_v34 = vadd.f32 %v281_v31, %v151_v24  ;;  %v283_v35 = vpop.f32.mrb[1].mxu1  ;;  %v1644_v21 = vld [vmem:[#allocation9 + $0xe0] ss:$8 sps:$4 sm:$0xff]  }
 0x14b   :  { %v241_v25 = vadd.f32 %v240_v23, %v147_v19  ;;  %v242_v26 = vpop.f32.mrb[2].mxu0  ;;  %v284_v38 = vadd.f32 %v283_v35, %v155_v27  ;;  %v285_v39 = vpop.f32.mrb[2].mxu1  ;;  %v1647_v23 = vld [vmem:[#allocation9 + $0xf0] ss:$8 sps:$4 sm:$0xff]  }
 0x14c   :  { %v243_v28 = vadd.f32 %v242_v26, %v143_v17  ;;  %v244_v29 = vpop.f32.mrb[3].mxu0  ;;  %v290_v32 = vmax.f32 %v239_v22, 0.0  ;;  %v292_v41 = vmax.f32 %v282_v34, 0.0  ;;  %v286_v42 = vadd.f32 %v285_v39, %v151_v24  ;;  %v287_v43 = vpop.f32.mrb[3].mxu1  ;;  %v1643_v17 = vld [vmem:[#allocation9 + $0xd4] ss:$8 sps:$4 sm:$0xff]  }
 0x14d   :  { %v245_v30 = vadd.f32 %v244_v29, %v147_v19  ;;  %v291_v36 = vmax.f32 %v241_v25, 0.0  ;;  %v293_v47 = vmax.f32 %v284_v38, 0.0  ;;  %v288_v49 = vadd.f32 %v287_v43, %v155_v27  ;;  %v1641_v19 = vld [vmem:[#allocation9 + $0xd0] ss:$8 sps:$4 sm:$0xff]   ;;  %v1649_v22 = vld [vmem:[#allocation9 + $0xf4] ss:$8 sps:$4 sm:$0xff]  }
 0x14e   :  { %v294_v33 = vmax.f32 %v243_v28, 0.0  ;;  %v296_v52 = vmax.f32 %v286_v42, 0.0  ;;  %v1694_v24 = vld [vmem:[#allocation7 + $0xe4] ss:$8 sps:$4 sm:$0xff]   ;;  %v1692_v25 = vld [vmem:[#allocation7 + $0xe0] ss:$8 sps:$4 sm:$0xff]  }
 0x14f   :  { %v295_v37 = vmax.f32 %v245_v30, 0.0  ;;  %v297_v53 = vmax.f32 %v288_v49, 0.0  ;;  %785 = vmatprep.subr.bf16.mxu1 %v1694_v24  ;;  %v1697_v26 = vld [vmem:[#allocation7 + $0xf4] ss:$8 sps:$4 sm:$0xff]   ;;  %v1695_v27 = vld [vmem:[#allocation7 + $0xf0] ss:$8 sps:$4 sm:$0xff]  }
 0x150   :  { %v298_v40 = vpack.c.bf16 %v294_v33, %v290_v32  ;;  %v835_v54 = vpack.c.bf16 %v296_v52, %v292_v41  ;;  %786 = vmatpush1.bf16.msra.mxu1 %v1692_v25  ;;  %v1700_v28 = vld [vmem:[#allocation10 + $0x4] ss:$8 sps:$4 sm:$0xff]   ;;  %v332_v29 = vld [vmem:[%s2128_s4] sm:$0x3]  ;;  %v1703_v49 = vld [vmem:[#allocation10 + $0x14] ss:$8 sps:$4 sm:$0xff]  }
 0x151   :  { %v299_v44 = vpack.c.bf16 %v295_v37, %v291_v36  ;;  %v836_v56 = vpack.c.bf16 %v297_v53, %v293_v47  ;;  %787 = vmatprep.subr.bf16.mxu1 %v1697_v26  ;;  %v337_v30 = vrot.slane %v332_v29, %v2068_v12  ;;  %v341_v31 = vrot.slane %v332_v29, %v2074_v14  ;;  %v1698_v47 = vld [vmem:[#allocation10] ss:$8 sps:$4 sm:$0xff]   ;;  %v1706_v52 = vld [vmem:[#allocation10 + $0x24] ss:$8 sps:$4 sm:$0xff]   ;;  %v1743_v29 = vld [vmem:[#allocation10 + $0xf0] ss:$8 sps:$4 sm:$0xff]  }
 0x152   :  { %v1704_v53 = vld [vmem:[#allocation10 + $0x20] ss:$8 sps:$4 sm:$0xff]  }
 0x153   :  { %536 = vmatprep.mubr.bf16.mxu0 %v299_v44 }
 0x154   :  { %537 = vmatmul.mubr.bf16.vlgmr.msra.gmra.mrb[4].mxu0 %v298_v40  ;;  %788 = vmatpush1.bf16.msra.mxu1 %v1695_v27 }
 0x155   :  { %1042 = vmatpush1.bf16.msra.mxu0 %v1602_v45  ;;  %1073 = vmatprep.mubr.bf16.mxu0 %v836_v56  ;;  %v1712_v56 = vld [vmem:[#allocation10 + $0x44] ss:$8 sps:$4 sm:$0xff]  }
 0x156   :  { %1043 = vmatprep.subr.bf16.mxu0 %v1607_v51  ;;  %1294 = vmatprep.subr.bf16.mxu1 %v1700_v28  ;;  %v1701_v51 = vld [vmem:[#allocation10 + $0x10] ss:$8 sps:$4 sm:$0xff]  }
 0x159   :  { %1044 = vmatpush1.bf16.msra.mxu0 %v1605_v55  ;;  %v1707_v55 = vld [vmem:[#allocation10 + $0x30] ss:$8 sps:$4 sm:$0xff]  }
 0x15a   :  { %1045 = vmatprep.subr.bf16.mxu0 %v1610_v57  ;;  %v1710_v57 = vld [vmem:[#allocation10 + $0x40] ss:$8 sps:$4 sm:$0xff]  }
 0x15d   :  { %1046 = vmatpush1.bf16.msra.mxu0 %v1608_v58  ;;  %v1715_v58 = vld [vmem:[#allocation10 + $0x54] ss:$8 sps:$4 sm:$0xff]  }
 0x15e   :  { %1047 = vmatprep.subr.bf16.mxu0 %v1613_v59  ;;  %v1713_v59 = vld [vmem:[#allocation10 + $0x50] ss:$8 sps:$4 sm:$0xff]  }
 0x161   :  { %1048 = vmatpush1.bf16.msra.mxu0 %v1611_v60  ;;  %v1718_v60 = vld [vmem:[#allocation10 + $0x64] ss:$8 sps:$4 sm:$0xff]  }
 0x162   :  { %1049 = vmatprep.subr.bf16.mxu0 %v1616_v61  ;;  %v1716_v61 = vld [vmem:[#allocation10 + $0x60] ss:$8 sps:$4 sm:$0xff]  }
 0x165   :  { %1050 = vmatpush1.bf16.msra.mxu0 %v1614_v62  ;;  %v1721_v62 = vld [vmem:[#allocation10 + $0x74] ss:$8 sps:$4 sm:$0xff]  }
 0x166   :  { %1051 = vmatprep.subr.bf16.mxu0 %v1619_v63  ;;  %v1719_v63 = vld [vmem:[#allocation10 + $0x70] ss:$8 sps:$4 sm:$0xff]  }
 0x169   :  { %1052 = vmatpush1.bf16.msra.mxu0 %v1617_v0  ;;  %v1724_v0 = vld [vmem:[#allocation10 + $0x84] ss:$8 sps:$4 sm:$0xff]  }
 0x16a   :  { %1053 = vmatprep.subr.bf16.mxu0 %v1622_v1  ;;  %v1722_v1 = vld [vmem:[#allocation10 + $0x80] ss:$8 sps:$4 sm:$0xff]  }
 0x16d   :  { %1054 = vmatpush1.bf16.msra.mxu0 %v1620_v2  ;;  %v1727_v2 = vld [vmem:[#allocation10 + $0x94] ss:$8 sps:$4 sm:$0xff]  }
 0x16e   :  { %1055 = vmatprep.subr.bf16.mxu0 %v1625_v3  ;;  %v1725_v3 = vld [vmem:[#allocation10 + $0x90] ss:$8 sps:$4 sm:$0xff]  }
 0x171   :  { %1056 = vmatpush1.bf16.msra.mxu0 %v1623_v4  ;;  %v1730_v4 = vld [vmem:[#allocation10 + $0xa4] ss:$8 sps:$4 sm:$0xff]  }
 0x172   :  { %1057 = vmatprep.subr.bf16.mxu0 %v1628_v5  ;;  %v1728_v5 = vld [vmem:[#allocation10 + $0xa0] ss:$8 sps:$4 sm:$0xff]  }
 0x175   :  { %1058 = vmatpush1.bf16.msra.mxu0 %v1626_v6  ;;  %v1733_v6 = vld [vmem:[#allocation10 + $0xb4] ss:$8 sps:$4 sm:$0xff]  }
 0x176   :  { %1059 = vmatprep.subr.bf16.mxu0 %v1631_v7  ;;  %v1731_v7 = vld [vmem:[#allocation10 + $0xb0] ss:$8 sps:$4 sm:$0xff]  }
 0x179   :  { %1060 = vmatpush1.bf16.msra.mxu0 %v1629_v8  ;;  %v1736_v8 = vld [vmem:[#allocation10 + $0xc4] ss:$8 sps:$4 sm:$0xff]  }
 0x17a   :  { %1061 = vmatprep.subr.bf16.mxu0 %v1634_v9  ;;  %v1734_v9 = vld [vmem:[#allocation10 + $0xc0] ss:$8 sps:$4 sm:$0xff]  }
 0x17d   :  { %1062 = vmatpush1.bf16.msra.mxu0 %v1632_v10  ;;  %v1739_v10 = vld [vmem:[#allocation10 + $0xd4] ss:$8 sps:$4 sm:$0xff]  }
 0x17e   :  { %1063 = vmatprep.subr.bf16.mxu0 %v1637_v11  ;;  %v869_v11 = vld [vmem:[%s2132_s8] sm:$0x3] }
 0x181   :  { %1064 = vmatpush1.bf16.msra.mxu0 %v1635_v13  ;;  %v1737_v13 = vld [vmem:[#allocation10 + $0xd0] ss:$8 sps:$4 sm:$0xff]  }
 0x182   :  { %1065 = vmatprep.subr.bf16.mxu0 %v1640_v15  ;;  %v874_v15 = vrot.slane %v869_v11, %v2068_v12 }
 0x185   :  { %1066 = vmatpush1.bf16.msra.mxu0 %v1638_v16  ;;  %v1742_v16 = vld [vmem:[#allocation10 + $0xe4] ss:$8 sps:$4 sm:$0xff]  }
 0x186   :  { %1067 = vmatprep.subr.bf16.mxu0 %v1643_v17  ;;  %v878_v17 = vrot.slane %v869_v11, %v2074_v14 }
 0x189   :  { %1068 = vmatpush1.bf16.msra.mxu0 %v1641_v19 }
 0x18a   :  { %1069 = vmatprep.subr.bf16.mxu0 %v1646_v20  ;;  %v1740_v20 = vld [vmem:[#allocation10 + $0xe0] ss:$8 sps:$4 sm:$0xff]  }
 0x18d   :  { %1070 = vmatpush1.bf16.msra.mxu0 %v1644_v21 }
 0x18e   :  { %1071 = vmatprep.subr.bf16.mxu0 %v1649_v22 }
 0x191   :  { %1072 = vmatpush1.bf16.msra.mxu0 %v1647_v23  ;;  %v1745_v23 = vld [vmem:[#allocation10 + $0xf4] ss:$8 sps:$4 sm:$0xff]  }
 0x194   :  { %1074 = vmatmul.mubr.bf16.vlgmr.msra.gmra.mrb[8].mxu0 %v835_v54  ;;  %v1709_v54 = vld [vmem:[#allocation10 + $0x34] ss:$8 sps:$4 sm:$0xff]  }
 0x227   :  { %v538_v32 = vpop.f32.mrb[4].mxu0 }
 0x228   :  { %v539_v33 = vadd.f32 %v538_v32, %v337_v30  ;;  %v540_v34 = vpop.f32.mrb[5].mxu0 }
 0x229   :  { %v541_v35 = vadd.f32 %v540_v34, %v341_v31  ;;  %v542_v36 = vpop.f32.mrb[6].mxu0 }
 0x22a   :  { %v543_v37 = vadd.f32 %v542_v36, %v337_v30  ;;  %v544_v38 = vpop.f32.mrb[7].mxu0  ;;  %v547_v40 = vmax.f32 %v539_v33, 0.0  ;;  %v585_v36 = vld [vmem:[%s2130_s6] sm:$0x3] }
 0x22b   :  { %v545_v39 = vadd.f32 %v544_v38, %v341_v31  ;;  %v548_v42 = vmax.f32 %v541_v35, 0.0  ;;  %v810_v38 = vrot.slane %v2059_v48, %v2068_v12 }
 0x22c   :  { %v549_v41 = vmax.f32 %v543_v37, 0.0  ;;  %v590_v37 = vrot.slane %v585_v36, %v2068_v12 }
 0x22d   :  { %v550_v43 = vmax.f32 %v545_v39, 0.0  ;;  %v814_v39 = vrot.slane %v2059_v48, %v150_v18 }
 0x22e   :  { %v551_v44 = vpack.c.bf16 %v549_v41, %v547_v40  ;;  %v594_v40 = vrot.slane %v585_v36, %v2074_v14 }
 0x22f   :  { %v552_v45 = vpack.c.bf16 %v550_v43, %v548_v42 }
 0x231   :  { %789 = vmatprep.mubr.bf16.mxu1 %v552_v45 }
 0x232   :  { %790 = vmatmul.mubr.bf16.vlgmr.msra.gmra.mrb[4].mxu1 %v551_v44  ;;  %v820_v44 = vrot.slane %v810_v38, %v2068_v12 }
 0x233   :  { %1295 = vmatpush1.bf16.msra.mxu1 %v1698_v47 }
 0x234   :  { %1296 = vmatprep.subr.bf16.mxu1 %v1703_v49  ;;  %v824_v49 = vrot.slane %v814_v39, %v2068_v12 }
 0x237   :  { %1297 = vmatpush1.bf16.msra.mxu1 %v1701_v51 }
 0x238   :  { %1298 = vmatprep.subr.bf16.mxu1 %v1706_v52 }
 0x23b   :  { %1299 = vmatpush1.bf16.msra.mxu1 %v1704_v53 }
 0x23c   :  { %1300 = vmatprep.subr.bf16.mxu1 %v1709_v54 }
 0x23f   :  { %1301 = vmatpush1.bf16.msra.mxu1 %v1707_v55 }
 0x240   :  { %1302 = vmatprep.subr.bf16.mxu1 %v1712_v56 }
 0x243   :  { %1303 = vmatpush1.bf16.msra.mxu1 %v1710_v57 }
 0x244   :  { %1304 = vmatprep.subr.bf16.mxu1 %v1715_v58 }
 0x247   :  { %1305 = vmatpush1.bf16.msra.mxu1 %v1713_v59 }
 0x248   :  { %1306 = vmatprep.subr.bf16.mxu1 %v1718_v60 }
 0x24b   :  { %1307 = vmatpush1.bf16.msra.mxu1 %v1716_v61 }
 0x24c   :  { %1308 = vmatprep.subr.bf16.mxu1 %v1721_v62  ;;  %v1122_v62 = vld [vmem:[%s2134_s10] sm:$0x3] }
 0x24f   :  { %1309 = vmatpush1.bf16.msra.mxu1 %v1719_v63  ;;  %v1127_v63 = vrot.slane %v1122_v62, %v2068_v12 }
 0x250   :  { %1310 = vmatprep.subr.bf16.mxu1 %v1724_v0  ;;  %v1344_v0 = vrot.slane %v2059_v48, %v2074_v14 }
 0x253   :  { %1311 = vmatpush1.bf16.msra.mxu1 %v1722_v1  ;;  %v1131_v1 = vrot.slane %v1122_v62, %v2074_v14 }
 0x254   :  { %1312 = vmatprep.subr.bf16.mxu1 %v1727_v2 }
 0x257   :  { %1313 = vmatpush1.bf16.msra.mxu1 %v1725_v3 }
 0x258   :  { %1314 = vmatprep.subr.bf16.mxu1 %v1730_v4 }
 0x25b   :  { %1315 = vmatpush1.bf16.msra.mxu1 %v1728_v5  ;;  %v1354_v5 = vrot.slane %v1344_v0, %v2074_v14 }
 0x25c   :  { %1316 = vmatprep.subr.bf16.mxu1 %v1733_v6 }
 0x25f   :  { %1317 = vmatpush1.bf16.msra.mxu1 %v1731_v7 }
 0x260   :  { %1318 = vmatprep.subr.bf16.mxu1 %v1736_v8  ;;  %v1358_v8 = vrot.slane %v2065_v50, %v2074_v14  ;;  %v1530_v50 = vld [vmem:[%s2136_s12] ss:$0 sm:$0xff] }
 0x263   :  { %1319 = vmatpush1.bf16.msra.mxu1 %v1734_v9 }
 0x264   :  { %1320 = vmatprep.subr.bf16.mxu1 %v1739_v10 }
 0x267   :  { %v1075_v19 = vpop.f32.mrb[8].mxu0  ;;  %1321 = vmatpush1.bf16.msra.mxu1 %v1737_v13 }
 0x268   :  { %v1076_v21 = vadd.f32 %v1075_v19, %v874_v15  ;;  %v1077_v22 = vpop.f32.mrb[9].mxu0  ;;  %1322 = vmatprep.subr.bf16.mxu1 %v1742_v16 }
 0x269   :  { %v1078_v24 = vadd.f32 %v1077_v22, %v878_v17  ;;  %v1079_v25 = vpop.f32.mrb[10].mxu0 }
 0x26a   :  { %v1080_v26 = vadd.f32 %v1079_v25, %v874_v15  ;;  %v1081_v27 = vpop.f32.mrb[11].mxu0  ;;  %v1084_v30 = vmax.f32 %v1076_v21, 0.0 }
 0x26b   :  { %v1082_v28 = vadd.f32 %v1081_v27, %v878_v17  ;;  %1323 = vmatpush1.bf16.msra.mxu1 %v1740_v20  ;;  %v1085_v32 = vmax.f32 %v1078_v24, 0.0 }
 0x26c   :  { %v1086_v31 = vmax.f32 %v1080_v26, 0.0  ;;  %1324 = vmatprep.subr.bf16.mxu1 %v1745_v23 }
 0x26d   :  { %v1087_v33 = vmax.f32 %v1082_v28, 0.0 }
 0x26e   :  { %v1088_v34 = vpack.c.bf16 %v1086_v31, %v1084_v30 }
 0x26f   :  { %v1089_v35 = vpack.c.bf16 %v1087_v33, %v1085_v32  ;;  %1325 = vmatpush1.bf16.msra.mxu1 %v1743_v29 }
 0x271   :  { %1326 = vmatprep.mubr.bf16.mxu1 %v1089_v35 }
 0x272   :  { %1327 = vmatmul.mubr.bf16.vlgmr.msra.gmra.mrb[8].mxu1 %v1088_v34 }
 0x305   :  { %v791_v41 = vpop.f32.mrb[4].mxu1 }
 0x306   :  { %v792_v42 = vadd.f32 %v791_v41, %v590_v37  ;;  %v793_v43 = vpop.f32.mrb[5].mxu1 }
 0x307   :  { %v794_v45 = vadd.f32 %v793_v43, %v594_v40  ;;  %v795_v47 = vpop.f32.mrb[6].mxu1 }
 0x308   :  { %v800_v51 = vmax.f32 %v792_v42, 0.0  ;;  %v796_v52 = vadd.f32 %v795_v47, %v590_v37  ;;  %v797_v53 = vpop.f32.mrb[7].mxu1 }
 0x309   :  { %v801_v54 = vmax.f32 %v794_v45, 0.0  ;;  %v798_v55 = vadd.f32 %v797_v53, %v594_v40 }
 0x30a   :  { %v802_v56 = vmax.f32 %v796_v52, 0.0  ;;  %v825_v46 = vmul.f32 %v820_v44, %v800_v51 }
 0x30b   :  { %v803_v57 = vmax.f32 %v798_v55, 0.0  ;;  %v826_v18 = vmul.f32 %v824_v49, %v801_v54 }
 0x30c   :  { %v827_v58 = vmul.f32 %v820_v44, %v802_v56 }
 0x30d   :  { %v828_v59 = vmul.f32 %v824_v49, %v803_v57  ;;  %v829_v60 = vadd.f32 %v826_v18, %v825_v46 }
 0x30f   :  { %830 = vadd.xlane.f32.xlu0 %v829_v60  ;;  %v832_v61 = vadd.f32 %v828_v59, %v827_v58 }
 0x313   :  { %833 = vadd.xlane.f32.xlu0 %v832_v61 }
 0x345   :  { %v1328_v2 = vpop.f32.mrb[8].mxu1 }
 0x346   :  { %v1329_v3 = vadd.f32 %v1328_v2, %v1127_v63  ;;  %v1330_v4 = vpop.f32.mrb[9].mxu1 }
 0x347   :  { %v1331_v6 = vadd.f32 %v1330_v4, %v1131_v1  ;;  %v1332_v7 = vpop.f32.mrb[10].mxu1 }
 0x348   :  { %v1337_v9 = vmax.f32 %v1329_v3, 0.0  ;;  %v1333_v10 = vadd.f32 %v1332_v7, %v1127_v63  ;;  %v1334_v11 = vpop.f32.mrb[11].mxu1 }
 0x349   :  { %v1338_v13 = vmax.f32 %v1331_v6, 0.0  ;;  %v1335_v12 = vadd.f32 %v1334_v11, %v1131_v1 }
 0x34a   :  { %v1339_v15 = vmax.f32 %v1333_v10, 0.0  ;;  %v1359_v16 = vmul.f32 %v1354_v5, %v1337_v9 }
 0x34b   :  { %v1340_v48 = vmax.f32 %v1335_v12, 0.0  ;;  %v1360_v17 = vmul.f32 %v1358_v8, %v1338_v13 }
 0x34c   :  { %v1361_v19 = vmul.f32 %v1354_v5, %v1339_v15 }
 0x34d   :  { %v1362_v20 = vmul.f32 %v1358_v8, %v1340_v48  ;;  %v1363_v21 = vadd.f32 %v1360_v17, %v1359_v16 }
 0x34f   :  { %1364 = vadd.xlane.f32.xlu1 %v1363_v21  ;;  %v1366_v22 = vadd.f32 %v1362_v20, %v1361_v19 }
 0x353   :  { %1367 = vadd.xlane.f32.xlu1 %v1366_v22 }
 0x39c   :  { %v831_v23 = vpop.xlane.xlu0 %830 }
 0x3a0   :  { %v834_v26 = vpop.xlane.xlu0 %833 }
 0x3dc   :  { %v1365_v14 = vpop.xlane.xlu1 %1364 }
 0x3dd   :  { %v1370_v24 = vsel %vm1369_vm1, %v831_v23, %v1365_v14 }
 0x3de   :  { %v1379_v25 = vadd.f32 %v1530_v50, %v1370_v24 }
 0x3e0   :  { %1382 = vst.msk [vmem:[%s2137_s13] sm:$0xff] %vm1381_vm2, %v1379_v25  ;;  %v1368_v27 = vpop.xlane.xlu1 %1367 }
 0x3e1   :  { %v1371_v28 = vsel %vm1369_vm1, %v834_v26, %v1368_v27 }
 0x3e2   :  { %v1380_v29 = vadd.f32 %v1530_v50, %v1371_v28 }
 0x3e4   :  { %1383 = vst.msk [vmem:[%s2137_s13 + $0x8] sm:$0xff] %vm1381_vm2, %v1380_v29 }
 0x3e5   :  { %1388 = vsyncpa [#allocation3], 1 }
 0x3e6   :  { %1389 = vsyncpa [#allocation5], 1 }
 0x3e7   :  { %1390 = vsyncpa [#allocation8], 1 }
 0x3e8   :  { %1391 = vsyncpa [#allocation11], 1 }

</bundles_post_ra>
